<compile_context>
chip_gen: v7x
topology: tpu7x:2x2x1
jax: 0.10.0
libtpu: 0.0.40
codegen_flags: <defaults>
</compile_context>

<pallas_src>
import functools
import math

import jax
import jax.numpy as jnp
from jax.experimental import pallas as pl
from jax.experimental.pallas import tpu as pltpu


# --------------------------------------------------------------------------- #
# Pallas kernel: one RGCN layer   out = act( sum_r A[r] @ (H @ W[r]) )
# --------------------------------------------------------------------------- #
def _rgcn_layer_kernel(a_ref, h_ref, w_ref, o_ref, acc_ref, *, activation, nclass):
    r = pl.program_id(1)   # relation (reduction axis)
    j = pl.program_id(2)   # adjacency column tile (reduction axis)

    @pl.when(jnp.logical_and(r == 0, j == 0))
    def _():
        acc_ref[...] = jnp.zeros_like(acc_ref)

    # Fused S-tile = H[col_tile] @ W[r]  (recomputed per row tile; keeps the MXU fed
    # and avoids an HBM round trip for the intermediate). f32 accumulation, then the
    # result is fed back to the MXU in bf16.
    s = jnp.dot(h_ref[...], w_ref[...], preferred_element_type=jnp.float32)
    acc_ref[...] += jnp.dot(a_ref[...], s.astype(jnp.bfloat16),
                            preferred_element_type=jnp.float32)

    is_last = jnp.logical_and(r == pl.num_programs(1) - 1,
                              j == pl.num_programs(2) - 1)

    @pl.when(is_last)
    def _():
        acc = acc_ref[...]
        if activation == "relu":
            out = jnp.maximum(acc, 0.0)
        else:  # numerically stable log_softmax over the first `nclass` lanes only
            lane = jax.lax.broadcasted_iota(jnp.int32, acc.shape, dimension=1)
            logits = jnp.where(lane < nclass, acc, -1e30)
            m = jnp.max(logits, axis=-1, keepdims=True)
            ex = jnp.exp(logits - m)
            lse = jnp.log(jnp.sum(ex, axis=-1, keepdims=True)) + m
            out = logits - lse
        o_ref[...] = out.astype(o_ref.dtype)


def _rgcn_layer(adj, h, w, *, activation, nclass, out_dtype, tm=128, tk=128):
    """adj: (R, Np, Np) bf16, h: (Np, in_pad) bf16, w: (R, in_pad, out_pad) bf16."""
    R, Np, _ = adj.shape
    in_pad = h.shape[1]
    out_pad = w.shape[-1]
    assert Np % tm == 0 and Np % tk == 0
    n_row, n_col = Np // tm, Np // tk

    # Advisory cost estimate so XLA can schedule around the kernel.
    flops = 2 * R * Np * Np * out_pad + 2 * n_row * R * Np * in_pad * out_pad
    transcendentals = Np * (out_pad + 1) if activation == "log_softmax" else 0
    bytes_accessed = int(
        2 * (R * Np * Np                       # A (bf16)
             + n_row * R * Np * in_pad         # H column tiles (re-read per row/rel)
             + n_row * n_col * R * in_pad * out_pad)  # W[r] per grid step
        + Np * out_pad * jnp.dtype(out_dtype).itemsize)

    kernel = functools.partial(_rgcn_layer_kernel,
                               activation=activation, nclass=nclass)

    return pl.pallas_call(
        kernel,
        out_shape=jax.ShapeDtypeStruct((Np, out_pad), out_dtype),
        grid_spec=pltpu.PrefetchScalarGridSpec(
            num_scalar_prefetch=0,
            grid=(n_row, R, n_col),
            in_specs=[
                # A[r] row x col tile: streamed + double-buffered by the BlockSpec.
                pl.BlockSpec((None, tm, tk), lambda i, r, j: (r, i, j)),
                # H column tile (the rows of H touched by A's column tile).
                pl.BlockSpec((tk, in_pad), lambda i, r, j: (j, 0)),
                # W[r]: tiny, effectively VMEM-resident.
                pl.BlockSpec((None, in_pad, out_pad), lambda i, r, j: (r, 0, 0)),
            ],
            out_specs=pl.BlockSpec((tm, out_pad), lambda i, r, j: (i, 0)),
            scratch_shapes=[pltpu.VMEM((tm, out_pad), jnp.float32)],
        ),
        compiler_params=pltpu.CompilerParams(
            dimension_semantics=("parallel", "arbitrary", "arbitrary"),
            vmem_limit_bytes=32 * 1024 * 1024,
        ),
        cost_estimate=pl.CostEstimate(flops=int(flops),
                                      transcendentals=int(transcendentals),
                                      bytes_accessed=bytes_accessed),
    )(adj, h, w)


# --------------------------------------------------------------------------- #
# Wrapper: densify edges, pad to TPU-friendly shapes, run the two layers.
# --------------------------------------------------------------------------- #
def build_dense_adjacency(edge_index, edge_type, edge_attr, num_nodes, num_relations):
    """A[r, i, j] = (sum of weights of j->i edges of type r) / (# such edges);
    this is PyG RGCNConv's default 'mean' aggregation with the edge_weight message."""
    src, dst = edge_index[0], edge_index[1]
    A = jnp.zeros((num_relations, num_nodes, num_nodes), jnp.float32)
    A = A.at[edge_type, dst, src].add(edge_attr.astype(jnp.float32))
    cnt = jnp.zeros((num_relations, num_nodes), jnp.float32)
    cnt = cnt.at[edge_type, dst].add(1.0)
    return A / jnp.maximum(cnt, 1.0)[:, :, None]


def _round_up(v, m):
    return (v + m - 1) // m * m


def _pad_to(a, shape):
    return jnp.pad(a, [(0, s - d) for d, s in zip(a.shape, shape)])


def rgcn_forward(x, edge_index, edge_type, edge_attr, params, *, num_classes,
                 tm=128, tk=128):
    W1, W2 = params["W1"], params["W2"]          # (R, F, H), (R, H, C)
    R = W1.shape[0]
    N, F = x.shape
    H = W1.shape[-1]
    C = W2.shape[-1]
    assert C == num_classes

    A = build_dense_adjacency(edge_index, edge_type, edge_attr, N, R)

    Np = _round_up(N, math.lcm(tm, tk))
    Fp, Hp, Cp = (_round_up(d, 128) for d in (F, H, C))

    # bf16 operands (A streaming is memory-bound), zero-padded to lane-dense shapes.
    A_p = _pad_to(A, (R, Np, Np)).astype(jnp.bfloat16)
    x_p = _pad_to(x, (Np, Fp)).astype(jnp.bfloat16)
    W1_p = _pad_to(W1, (R, Fp, Hp)).astype(jnp.bfloat16)
    W2_p = _pad_to(W2, (R, Hp, Cp)).astype(jnp.bfloat16)

    h1 = _rgcn_layer(A_p, x_p, W1_p, activation="relu", nclass=None,
                     out_dtype=jnp.bfloat16, tm=tm, tk=tk)
    out = _rgcn_layer(A_p, h1, W2_p, activation="log_softmax", nclass=C,
                      out_dtype=jnp.float32, tm=tm, tk=tk)
    return out[:N, :C]


# --------------------------------------------------------------------------- #
# Pure-JAX references
# --------------------------------------------------------------------------- #
def reference_dense(x, A, W1, W2):
    h1 = jax.nn.relu(jnp.einsum("rij,jf,rfh->ih", A, x, W1))
    logits = jnp.einsum("rij,jh,rhc->ic", A, h1, W2)
    return jax.nn.log_softmax(logits, axis=1)


def reference_edgelist(x, edge_index, edge_type, edge_attr, W1, W2, num_relations):
    src, dst = edge_index[0], edge_index[1]
    N = x.shape[0]

    def conv(h, W):
        out = jnp.zeros((N, W.shape[-1]), jnp.float32)
        for r in range(num_relations):
            mask = edge_type == r
            w = jnp.where(mask, edge_attr, 0.0).astype(jnp.float32)
            msg = (w[:, None] * h[src]) @ W[r]
            summed = jnp.zeros((N, W.shape[-1]), jnp.float32).at[dst].add(msg)
            cnt = jnp.zeros((N,), jnp.float32).at[dst].add(mask.astype(jnp.float32))
            out = out + summed / jnp.maximum(cnt, 1.0)[:, None]
        return out

    h1 = jax.nn.relu(conv(x, W1))
    return jax.nn.log_softmax(conv(h1, W2), axis=1)


# --------------------------------------------------------------------------- #
if __name__ == "__main__":
    N, F, Hdim, C, R, E = 200, 48, 64, 10, 3, 1200

    key = jax.random.PRNGKey(0)
    kx, ke, kt, kw, k1, k2 = jax.random.split(key, 6)

    x = jax.random.normal(kx, (N, F), jnp.float32)
    edge_index = jax.random.randint(ke, (2, E), 0, N, dtype=jnp.int32)
    edge_type = jax.random.randint(kt, (E,), 0, R, dtype=jnp.int32)
    edge_attr = jax.random.uniform(kw, (E,), jnp.float32)

    def glorot(k, shape):
        fan_in, fan_out = shape[-2], shape[-1]
        a = (6.0 / (fan_in + fan_out)) ** 0.5
        return jax.random.uniform(k, shape, jnp.float32, -a, a)

    params = {"W1": glorot(k1, (R, F, Hdim)), "W2": glorot(k2, (R, Hdim, C))}

    out = rgcn_forward(x, edge_index, edge_type, edge_attr, params, num_classes=C)
    out = jax.block_until_ready(out)

    A = build_dense_adjacency(edge_index, edge_type, edge_attr, N, R)
    ref_d = reference_dense(x, A, params["W1"], params["W2"])
    ref_e = reference_edgelist(x, edge_index, edge_type, edge_attr,
                               params["W1"], params["W2"], R)

    assert out.shape == (N, C)
    # Dense formulation == edge-list message passing (both f32, tight tolerance).
    assert jnp.allclose(ref_d, ref_e, atol=1e-4, rtol=1e-4), "densification mismatch"
    # Pallas kernel (bf16 operands, f32 MXU accumulation) vs f32 reference:
    # loose tolerance accounts for bf16 input rounding across two layers.
    err = float(jnp.max(jnp.abs(out - ref_d)))
    assert err < 1e-1, f"kernel mismatch vs reference: max abs err = {err}"

    print("KERNEL_OK")
</pallas_src>

<mosaic_0001>
module attributes {stable_mosaic.version = 11 : i64} {
  func.func @_rgcn_layer_kernel(%arg0: i32, %arg1: i32, %arg2: i32, %arg3: memref<1x128x128xbf16, #tpu.memory_space<vmem>>, %arg4: memref<128x128xbf16, #tpu.memory_space<vmem>>, %arg5: memref<1x128x128xbf16, #tpu.memory_space<vmem>>, %arg6: memref<128x128xbf16, #tpu.memory_space<vmem>>, %arg7: memref<128x128xf32, #tpu.memory_space<vmem>>) attributes {dimension_semantics = [#tpu.dimension_semantics<parallel>, #tpu.dimension_semantics<arbitrary>, #tpu.dimension_semantics<arbitrary>], iteration_bounds = array<i64: 2, 3, 2>, scalar_prefetch = 0 : i64, scratch_operands = 1 : i64, tpu.core_type = #tpu.core_type<tc>, window_params = [{transform_indices = @transform_0, window_bounds = array<i64: 1, 128, 128>}, {transform_indices = @transform_1, window_bounds = array<i64: 128, 128>}, {transform_indices = @transform_2, window_bounds = array<i64: 1, 128, 128>}, {transform_indices = @transform_3, window_bounds = array<i64: 128, 128>}]} {
    %c0_i32 = arith.constant 0 : i32
    %0 = arith.cmpi eq, %arg1, %c0_i32 : i32
    %c0_i32_0 = arith.constant 0 : i32
    %1 = arith.cmpi eq, %arg2, %c0_i32_0 : i32
    %2 = arith.andi %0, %1 : i1
    %3 = arith.extui %2 : i1 to i32
    %c0_i32_1 = arith.constant 0 : i32
    %4 = arith.cmpi ne, %3, %c0_i32_1 : i32
    scf.if %4 {
      %cst_15 = arith.constant 0.000000e+00 : f32
      %21 = vector.broadcast %cst_15 : f32 to vector<128x128xf32>
      %c0_16 = arith.constant 0 : index
      %c0_17 = arith.constant 0 : index
      %22 = vector.load %arg7[%c0_16, %c0_17] : memref<128x128xf32, #tpu.memory_space<vmem>>, vector<128x128xf32>
      tpu.vector_store %arg7[%c0_16, %c0_17], %21 {strides = array<i32>} : memref<128x128xf32, #tpu.memory_space<vmem>>, vector<128x128xf32>,
    } else {
    }
    %c0 = arith.constant 0 : index
    %c0_2 = arith.constant 0 : index
    %5 = vector.load %arg4[%c0, %c0_2] : memref<128x128xbf16, #tpu.memory_space<vmem>>, vector<128x128xbf16>
    %c0_3 = arith.constant 0 : index
    %c0_4 = arith.constant 0 : index
    %c0_5 = arith.constant 0 : index
    %6 = vector.load %arg5[%c0_3, %c0_4, %c0_5] : memref<1x128x128xbf16, #tpu.memory_space<vmem>>, vector<1x128x128xbf16>
    %7 = vector.shape_cast %6 : vector<1x128x128xbf16> to vector<128x128xbf16>
    %cst = arith.constant dense<0.000000e+00> : vector<128x128xf32>
    %8 = tpu.matmul %5, %7, %cst {dimension_numbers = #tpu.dot_dimension_numbers<[1], [0], [0], [1], [0, 0, 1, 1], [], []>} : vector<128x128xbf16>, vector<128x128xbf16>, vector<128x128xf32> -> vector<128x128xf32>
    %c0_6 = arith.constant 0 : index
    %c0_7 = arith.constant 0 : index
    %9 = vector.load %arg7[%c0_6, %c0_7] : memref<128x128xf32, #tpu.memory_space<vmem>>, vector<128x128xf32>
    %c0_8 = arith.constant 0 : index
    %c0_9 = arith.constant 0 : index
    %c0_10 = arith.constant 0 : index
    %10 = vector.load %arg3[%c0_8, %c0_9, %c0_10] : memref<1x128x128xbf16, #tpu.memory_space<vmem>>, vector<1x128x128xbf16>
    %11 = vector.shape_cast %10 : vector<1x128x128xbf16> to vector<128x128xbf16>
    %12 = arith.truncf %8 : vector<128x128xf32> to vector<128x128xbf16>
    %cst_11 = arith.constant dense<0.000000e+00> : vector<128x128xf32>
    %13 = tpu.matmul %11, %12, %cst_11 {dimension_numbers = #tpu.dot_dimension_numbers<[1], [0], [0], [1], [0, 0, 1, 1], [], []>} : vector<128x128xbf16>, vector<128x128xbf16>, vector<128x128xf32> -> vector<128x128xf32>
    %14 = arith.addf %9, %13 : vector<128x128xf32>
    %c0_12 = arith.constant 0 : index
    %c0_13 = arith.constant 0 : index
    %15 = vector.load %arg7[%c0_12, %c0_13] : memref<128x128xf32, #tpu.memory_space<vmem>>, vector<128x128xf32>
    tpu.vector_store %arg7[%c0_12, %c0_13], %14 {strides = array<i32>} : memref<128x128xf32, #tpu.memory_space<vmem>>, vector<128x128xf32>,
    %c2_i32 = arith.constant 2 : i32
    %16 = arith.cmpi eq, %arg1, %c2_i32 : i32
    %c1_i32 = arith.constant 1 : i32
    %17 = arith.cmpi eq, %arg2, %c1_i32 : i32
    %18 = arith.andi %16, %17 : i1
    %19 = arith.extui %18 : i1 to i32
    %c0_i32_14 = arith.constant 0 : i32
    %20 = arith.cmpi ne, %19, %c0_i32_14 : i32
    scf.if %20 {
      %c0_15 = arith.constant 0 : index
      %c0_16 = arith.constant 0 : index
      %21 = vector.load %arg7[%c0_15, %c0_16] : memref<128x128xf32, #tpu.memory_space<vmem>>, vector<128x128xf32>
      %cst_17 = arith.constant 0.000000e+00 : f32
      %22 = vector.broadcast %cst_17 : f32 to vector<128x128xf32>
      %23 = arith.maximumf %21, %22 : vector<128x128xf32>
      %24 = arith.truncf %23 : vector<128x128xf32> to vector<128x128xbf16>
      %c0_18 = arith.constant 0 : index
      %c0_19 = arith.constant 0 : index
      %25 = vector.load %arg6[%c0_18, %c0_19] : memref<128x128xbf16, #tpu.memory_space<vmem>>, vector<128x128xbf16>
      tpu.vector_store %arg6[%c0_18, %c0_19], %24 {strides = array<i32>} : memref<128x128xbf16, #tpu.memory_space<vmem>>, vector<128x128xbf16>,
    } else {
    }
    return
  }
  func.func @transform_0(%arg0: i32, %arg1: i32, %arg2: i32) -> (i32, i32, i32) {
    %c0_i32 = arith.constant 0 : i32
    return %arg1, %arg0, %arg2 : i32, i32, i32
  }
  func.func @transform_1(%arg0: i32, %arg1: i32, %arg2: i32) -> (i32, i32) {
    %c0_i32 = arith.constant 0 : i32
    %c0_i32_0 = arith.constant 0 : i32
    return %arg2, %c0_i32 : i32, i32
  }
  func.func @transform_2(%arg0: i32, %arg1: i32, %arg2: i32) -> (i32, i32, i32) {
    %c0_i32 = arith.constant 0 : i32
    %c0_i32_0 = arith.constant 0 : i32
    %c0_i32_1 = arith.constant 0 : i32
    return %arg1, %c0_i32, %c0_i32_0 : i32, i32, i32
  }
  func.func @transform_3(%arg0: i32, %arg1: i32, %arg2: i32) -> (i32, i32) {
    %c0_i32 = arith.constant 0 : i32
    %c0_i32_0 = arith.constant 0 : i32
    return %arg0, %c0_i32 : i32, i32
  }
}

</mosaic_0001>

<bundles_post_ra>
// kernel: tpu_custom_call.1
= control target key start
LH: loop header
LB: loop body
LE: loop exit
PB: predicated region body
PF: predicated region fallthrough
CT: control target
= control target key end

     0   :  { %s2304_s0 = inlined_call_operand.hbm [shape: bf16[3,256,256], index: 0, kind: input, shape index: {}]   ;;  %s2305_s1 = inlined_call_operand.hbm [shape: bf16[256,128], index: 1, kind: input, shape index: {}]   ;;  %s2306_s2 = inlined_call_operand.hbm [shape: bf16[3,128,128], index: 2, kind: input, shape index: {}]   ;;  %s2307_s3 = inlined_call_operand.hbm [shape: bf16[256,128], index: 3, kind: output, shape index: {}]  }
   0x1   :  { %2330 = sst [smem:[#allocation29_spill]] %s2304_s0 }
   0x2   :  { %2331 = sst [smem:[#allocation30_spill]] %s2305_s1 }
   0x3   :  { %2332 = sst [smem:[#allocation31_spill]] %s2307_s3 }
   0x4   :  { %8 = vsyncpa [#allocation4], 0 }
   0x5   :  { %10 = vsyncpa [#allocation4 + $0x1], 0 }
   0x6   :  { %11 = vsyncpa [#allocation7], 0 }
   0x7   :  { %13 = vsyncpa [#allocation7 + $0x1], 0 }
   0x8   :  { %14 = vsyncpa [#allocation5], 0 }
   0x9   :  { %16 = vsyncpa [#allocation5 + $0x1], 0  ;;  %s1780_s12 = smov 0   ;;  %s1782_s13 = smov 0  }
   0xa   :  { %s1784_s14 = smov 0   ;;  %s1786_s15 = smov 0  }
   0xb   :  { %s1788_s16 = smov 0   ;;  %s1790_s17 = smov 0  }
   0xc   :  { %s1792_s18 = smov 0   ;;  %s1794_s19 = smov 0  }
   0xd   :  { %s1796_s20 = smov 0   ;;  %s1798_s21 = smov 0  }
   0xe   :  { %s1800_s22 = smov 0   ;;  %s1802_s23 = smov 0  }
   0xf   :  { %s1804_s24 = smov 0   ;;  %s1806_s25 = smov 0  }
  0x10   :  { %s1808_s26 = smov 0   ;;  %s1810_s27 = smov 0  }
  0x11   :  { %s1812_s28 = smov 0   ;;  %s1814_s29 = smov 0  }
  0x12   :  { %s1816_s30 = smov 0  }
  0x13 LB: > { %2333 = sst [smem:[#allocation14_spill]] %s1676_s12  ;;  %s1876_s4 = sadd.s32 4294967295, %s1748_s30   ;;  %s1748_s30 = sphi %s1816_s30, %s22_s30   ;;  %s1744_s29 = sphi %s1814_s29, %s2413_s29   ;;  %s1740_s28 = sphi %s1812_s28, %s2412_s28   ;;  %s1736_s27 = sphi %s1810_s27, %s2411_s27   ;;  %s1732_s26 = sphi %s1808_s26, %s2396_s26   ;;  %s1728_s25 = sphi %s1806_s25, %s2410_s25   ;;  %s1724_s24 = sphi %s1804_s24, %s2409_s24   ;;  %s1720_s23 = sphi %s1802_s23, %s2395_s23   ;;  %s1716_s22 = sphi %s1800_s22, %s2408_s22   ;;  %s1712_s21 = sphi %s1798_s21, %s2407_s21   ;;  %s1708_s20 = sphi %s1796_s20, %s2406_s20   ;;  %s1704_s19 = sphi %s1794_s19, %s2405_s19   ;;  %s1700_s18 = sphi %s1792_s18, %s2392_s18   ;;  %s1696_s17 = sphi %s1790_s17, %s2404_s17   ;;  %s1692_s16 = sphi %s1788_s16, %s2403_s16   ;;  %s1688_s15 = sphi %s1786_s15, %s2402_s15   ;;  %s1684_s14 = sphi %s1784_s14, %s2391_s14   ;;  %s1680_s13 = sphi %s1782_s13, %s2400_s13   ;;  %s1676_s12 = sphi %s1780_s12, %s2398_s12  }
  0x14   : > { %2334 = sst [smem:[#allocation15_spill]] %s1684_s14  ;;  %s34_s6 = sadd.s32 1, %s1736_s27 }
  0x15   : > { %2335 = sst [smem:[#allocation16_spill]] %s1704_s19  ;;  %s37_s7 = sadd.s32 1, %s1740_s28 }
  0x16   : > { %2336 = sst [smem:[#allocation17_spill]] %s1720_s23  ;;  %p35_p0 = scmp.ge.s32.totalorder %s34_s6, 2 }
  0x17   : > { %2337 = sst [smem:[#allocation18_spill]] %s1724_s24  ;;  %s41_s8 = sadd.s32 1, %s1744_s29 }
  0x18   : > { %2338 = sst [smem:[#allocation19_spill]] %s1728_s25  ;;  %p2319_p1 = scmp.eq.s32.totalorder %s1748_s30, 0 }
  0x19   : > { %2339 = sst [smem:[#allocation20_spill]] %s1732_s26  ;;  %p2317_p2 = scmp.eq.s32.totalorder %s1876_s4, 0 }
  0x1a   : > { %2340 = sst [smem:[#allocation21_spill]] %s1744_s29  ;;  %s2415_s6 = smov (%p35_p0, %s34_s6), 0 }
  0x1b   : > { %2341 = sst [smem:[#allocation22_spill]] %s2415_s6  ;;  %s2417_s7 = smov (!%p35_p0, %s37_s7), %s1740_s28 }
  0x1c   : > { %s48_s9 = ssub.s32 %s1736_s27, %s2415_s6  ;;  %s78_s10 = sadd.s32 1, %s1708_s20 }
  0x1d   : > { %p39_p3 = scmp.ge.s32.totalorder %s2417_s7, 3  ;;  %p76_p4 = scmp.eq.s32.totalorder %s48_s9, 0 }
  0x1e   : > { %p85_p5 = scmp.ne.s32.totalorder %s1708_s20, %s1704_s19  ;;  %p91_p6 = scmp.ne.s32.totalorder %s1704_s19, %s1700_s18 }
  0x1f   : > { %s2419_s7 = smov (%p39_p3, %s2417_s7), 0  ;;  %s2421_s8 = smov (!%p39_p3, %s41_s8), %s1744_s29 }
  0x20   : > { %2342 = sst [smem:[#allocation23_spill]] %s2419_s7  ;;  %s1899_s11 = ssub.s32 %s1740_s28, %s2419_s7 }
  0x21   : > { %p1903_p7 = por %p85_p5, %p2319_p1  ;;  %p43_p8 = scmp.ge.s32.totalorder %s2421_s8, 2 }
  0x22   : > { %p1909_p9 = por %p91_p6, %p2317_p2  ;;  %s130_s7 = sadd.s32 1, %s1684_s14 }
  0x23   : > { %s1914_s6 = scalar_select %p76_p4, %s1708_s20, %s78_s10  }
  0x24   : > { %s2344_s18 = scalar_select %p1909_p9, 1, 0 }
  0x25   : > { %2346 = sst [smem:[#allocation25_spill]] %s1914_s6  ;;  %s2423_s8 = smov (%p43_p8, %s2421_s8), 0 }
  0x26   : > { %2345 = sst [smem:[#allocation24_spill]] %s2344_s18  ;;  %s46_s3 = ssub.s32 %s1744_s29, %s2423_s8 }
  0x27   : > { %2347 = sst [smem:[#allocation26_spill]] %s2423_s8  ;;  %p140_p11 = scmp.ne.s32.totalorder %s1684_s14, %s1680_s13 }
  0x28   : > { %s47_s26 = sor.u32 %s46_s3, %s1899_s11  ;;  %p128_p12 = scmp.eq.s32.totalorder %s46_s3, 0 }
  0x29   : > { %s1925_s24 = sor.u32 %s48_s9, %s47_s26  ;;  %p141_p13 = scmp.eq.s32.totalorder %s1876_s4, 11 }
  0x2a   : > { %p146_p3 = scmp.ne.s32.totalorder %s1680_s13, %s1676_s12  ;;  %s2350_s8 = sadd.s32 4294967294, %s1748_s30  }
  0x2b   : > { %s1932_s10 = scalar_select %p128_p12, %s1684_s14, %s130_s7  }
  0x2c   : > { %p1934_p4 = por %p141_p13, %p140_p11  ;;  %p147_p5 = scmp.eq.s32.totalorder %s2350_s8, 11 }
  0x2d   : > { %2348 = sst [smem:[#allocation27_spill]] %s1932_s10  ;;  %p2318_p6 = scmp.lt.s32.totalorder %s1748_s30, 12 }
  0x2e   : > { %s2349_s6 = scalar_select %p1934_p4, 1, 0 }
  0x2f   : > { %p1941_p8 = por %p147_p5, %p146_p3  ;;  %s192_s26 = sand.u32 1, %s1748_s30  }
  0x30   : > { %s194_s9 = sand.u32 1, %s1708_s20   ;;  %s1096_s18 = sshll.u32 %s1736_s27, 10 }
  0x31   : > { %s2351_s3 = scalar_select %p1941_p8, 1, 0 }
  0x32   : > { %s1039_s25 = sshll.u32 %s194_s9, 6  ;;  %s2352_s1 = sld [smem:[#allocation30_spill]] }
  0x33   : > { %s196_s10 = scalar_lea.vmem [#allocation6], %s1039_s25  ;;  %p1957_p11 = pnand %p2318_p6, %p1903_p7 }
  0x34   : > { %s203_s8 = sshll.u32 %s196_s10, 4  ;;  %s1965_s12 = scalar_lea.sflag [#allocation7], %s192_s26  ;;  %s1961_s8 = int_to_ptr.vmem [resolvable:$true] %s203_s8 }
  0x35   : > { %p1466_p5 = pneg %p1957_p11 }
  0x38   : > { %s1951_s7 = scalar_lea.hbm %s2352_s1, %s1096_s18  ;;  %s1469_s18 = scalar_lea.hbm %s2352_s1, 2048 }
  0x39   : > { %s1464_s19 = scalar_lea.hbm %s1951_s7, 1024  ;;  %p1470_p7 = scmp.lt.u32.totalorder %s1951_s7, %s2352_s1 }
  0x3a   : > { %p1465_p3 = scmp.ne.s32.totalorder %s1951_s7, %s1464_s19  ;;  %p1471_p6 = scmp.lt.u32.totalorder %s1469_s18, %s1464_s19 }
  0x3b   : > { %p1473_p0 = scmp.lt.u32.totalorder %s1464_s19, %s1951_s7 }
  0x3c   : > { %p1467_p10 = pnand %p1466_p5, %p1465_p3  ;;  %p1472_p1 = por %p1471_p6, %p1470_p7 }
  0x3e   : > { %p1468_p2 = pneg %p1467_p10  ;;  %p1474_p12 = por %p1473_p0, %p1472_p1 }
  0x40   : > { %p1475_p13 = pnand %p1474_p12, %p1468_p2 }
  0x42   : > { %1478 = shalt.err (!%p1475_p13)
}
  0x43   : > { %s1479_s26 = scalar_lea.vmem %s1961_s8, 1024  ;;  %s1750_s25 = smov [#allocation6]  }
  0x44   : > { %p1480_p10 = scmp.ne.s32.totalorder %s1961_s8, %s1479_s26  ;;  %s1484_s5 = sshll.u32 %s1750_s25, 4  ;;  %s1485_s5 = int_to_ptr.vmem [resolvable:$false] %s1484_s5 }
  0x45   : > { %s1486_s10 = scalar_lea.vmem %s1485_s5, 2048  ;;  %p1487_p4 = scmp.lt.s32.totalorder %s1961_s8, %s1485_s5 }
  0x46   : > { %p1482_p3 = pnand %p1480_p10, %p1466_p5  ;;  %p1488_p6 = scmp.lt.s32.totalorder %s1486_s10, %s1479_s26 }
  0x48   : > { %p1483_p8 = pneg %p1482_p3  ;;  %p1489_p7 = por %p1488_p6, %p1487_p4 }
  0x4a   : > { %p1490_p1 = pnand %p1489_p7, %p1483_p8 }
  0x4c   : > { %1493 = shalt.err (!%p1490_p1)
}
  0x4d   : > { %s2321_s19 = smov 64   ;;  %s2323_s18 = smov 4  }
  0x4e   : > { %1272 = dma.hbm_to_vmem [thread:$0]  (!%p1957_p11), %s1951_s7, 1024, %s1961_s8, %s1965_s12, %s2321_s19, %s2321_s19, %s2323_s18  }
  0x4f   : > { %p2354_p2 = scmp.lt.s32.totalorder %s1748_s30, 13  ;;  %p2355_p0 = scmp.ge.s32.totalorder %s1748_s30, 1 }
  0x50   : > { %s52_s26 = sadd.s32 1, %s1720_s23  ;;  %p2357_p8 = scmp.eq.s32.totalorder %s1925_s24, 0 }
  0x51   : > { %p2000_p4 = pnand %p2355_p0, %p2354_p2  ;;  %p59_p12 = scmp.ne.s32.totalorder %s1720_s23, %s1716_s22 }
  0x52   : > { %s2008_s25 = scalar_select %p2357_p8, %s1720_s23, %s52_s26  }
  0x53   : > { %p65_p13 = scmp.ne.s32.totalorder %s1716_s22, %s1712_s21  ;;  %s167_s5 = sand.u32 1, %s1720_s23  }
  0x54   : > { %2358 = sst [smem:[#allocation28_spill]] %s2008_s25  ;;  %s1095_s10 = sshll.u32 %s1744_s29, 5 }
  0x55   : > { %p2359_p5 = scmp.eq.s32.totalorder %s1748_s30, 0  ;;  %p2360_p3 = scmp.eq.s32.totalorder %s1876_s4, 0 }
  0x56   : > { %s1034_s7 = sshll.u32 %s167_s5, 6  ;;  %s177_s8 = sadd.s32 %s1736_s27, %s1095_s10 }
  0x57   : > { %p61_p10 = por %p2359_p5, %p59_p12  ;;  %p2020_p6 = por %p2360_p3, %p65_p13 }
  0x58   : > { %s1037_s19 = sshll.u32 %s1740_s28, 6  ;;  %s171_s18 = scalar_lea.vmem [#allocation3], %s1034_s7 }
  0x59   : > { %s2361_s14 = scalar_select %p2020_p6, 1, 0 }
  0x5a   : > { %s182_s1 = sshll.u32 %s171_s18, 4  ;;  %s179_s24 = sadd.s32 %s1037_s19, %s177_s8  ;;  %s2026_s1 = int_to_ptr.vmem [resolvable:$true] %s182_s1 }
  0x5b   : > { %s1038_s26 = sshll.u32 %s179_s24, 6  ;;  %p2362_p11 = scmp.lt.s32.totalorder %s1748_s30, 12 }
  0x5c   : > { %s2364_s0 = sld [smem:[#allocation29_spill]]  ;;  %s2039_s19 = scalar_lea.sflag [#allocation4], %s167_s5 }
  0x5d   : > { %p2030_p7 = pnand %p2362_p11, %p61_p10 }
  0x5f   : > { %p1496_p2 = pneg %p2030_p7 }
  0x62   : > { %s2037_s23 = scalar_lea.hbm %s2364_s0, %s1038_s26  ;;  %s1499_s25 = scalar_lea.hbm %s2364_s0, 12288 }
  0x63   : > { %s1494_s18 = scalar_lea.hbm %s2037_s23, 1024  ;;  %p1500_p12 = scmp.lt.u32.totalorder %s2037_s23, %s2364_s0 }
  0x64   : > { %p1495_p1 = scmp.ne.s32.totalorder %s2037_s23, %s1494_s18  ;;  %p1501_p13 = scmp.lt.u32.totalorder %s1499_s25, %s1494_s18 }
  0x65   : > { %p1503_p10 = scmp.lt.u32.totalorder %s1494_s18, %s2037_s23 }
  0x66   : > { %p1497_p0 = pnand %p1496_p2, %p1495_p1  ;;  %p1502_p5 = por %p1501_p13, %p1500_p12 }
  0x68   : > { %p1498_p8 = pneg %p1497_p0  ;;  %p1504_p3 = por %p1503_p10, %p1502_p5 }
  0x6a   : > { %p1505_p11 = pnand %p1504_p3, %p1498_p8 }
  0x6c   : > { %1508 = shalt.err (!%p1505_p11)
}
  0x6d   : > { %s1509_s5 = scalar_lea.vmem %s2026_s1, 1024  ;;  %s1753_s24 = smov [#allocation3]  }
  0x6e   : > { %p1510_p1 = scmp.ne.s32.totalorder %s2026_s1, %s1509_s5  ;;  %s1514_s26 = sshll.u32 %s1753_s24, 4  ;;  %s1515_s26 = int_to_ptr.vmem [resolvable:$false] %s1514_s26 }
  0x6f   : > { %s1516_s10 = scalar_lea.vmem %s1515_s26, 2048  ;;  %p1517_p6 = scmp.lt.s32.totalorder %s2026_s1, %s1515_s26 }
  0x70   : > { %p1512_p0 = pnand %p1510_p1, %p1496_p2  ;;  %p1518_p12 = scmp.lt.s32.totalorder %s1516_s10, %s1509_s5 }
  0x72   : > { %p1513_p9 = pneg %p1512_p0  ;;  %p1519_p13 = por %p1518_p12, %p1517_p6 }
  0x74   : > { %p1520_p5 = pnand %p1519_p13, %p1513_p9 }
  0x76   : > { %1523 = shalt.err (!%p1520_p5)
}
  0x77   : > { %s1754_s18 = smov 128   ;;  %s2365_s29 = smov 4  }
  0x78   : > { %s2366_s25 = smov 64   ;;  %s104_s7 = sadd.s32 1, %s1696_s17 }
  0x79   : > { %1269 = dma.hbm_to_vmem [thread:$0]  (!%p2030_p7), %s2037_s23, 1024, %s2026_s1, %s2039_s19, %s1754_s18, %s2366_s25, %s2365_s29  }
  0x7a   : > { %p2367_p9 = scmp.eq.s32.totalorder %s1899_s11, 0  ;;  %p111_p6 = scmp.ne.s32.totalorder %s1696_s17, %s1692_s16 }
  0x7b   : > { %p117_p2 = scmp.ne.s32.totalorder %s1692_s16, %s1688_s15  ;;  %s215_s8 = sand.u32 1, %s1696_s17  }
  0x7c   : > { %s2073_s21 = scalar_select %p2367_p9, %s1696_s17, %s104_s7  }
  0x7d   : > { %s1097_s5 = sshll.u32 %s1740_s28, 10  ;;  %p2368_p8 = scmp.eq.s32.totalorder %s1748_s30, 0 }
  0x7e   : > { %p2369_p3 = scmp.eq.s32.totalorder %s1876_s4, 0  ;;  %s1042_s26 = sshll.u32 %s215_s8, 6 }
  0x7f   : > { %p113_p10 = por %p111_p6, %p2368_p8  ;;  %s2092_s1 = scalar_lea.hbm %s2306_s2, %s1097_s5 }
  0x80   : > { %p2085_p11 = por %p117_p2, %p2369_p3  ;;  %p2371_p7 = scmp.lt.s32.totalorder %s1748_s30, 12 }
  0x81   : > { %s217_s23 = scalar_lea.vmem [#allocation8], %s1042_s26  ;;  %s1524_s19 = scalar_lea.hbm %s2092_s1, 1024 }
  0x82   : > { %s2370_s24 = scalar_select %p2085_p11, 1, 0 }
  0x83   : > { %p2096_p1 = pnand %p2371_p7, %p113_p10  ;;  %s224_s11 = sshll.u32 %s217_s23, 4  ;;  %s2100_s11 = int_to_ptr.vmem [resolvable:$true] %s224_s11 }
  0x84   : > { %p1525_p0 = scmp.ne.s32.totalorder %s2092_s1, %s1524_s19  ;;  %s1529_s7 = scalar_lea.hbm %s2306_s2, 3072 }
  0x85   : > { %p1526_p12 = pneg %p2096_p1  ;;  %p1530_p9 = scmp.lt.u32.totalorder %s2092_s1, %s2306_s2 }
  0x86   : > { %p1531_p6 = scmp.lt.u32.totalorder %s1529_s7, %s1524_s19  ;;  %p1533_p8 = scmp.lt.u32.totalorder %s1524_s19, %s2092_s1 }
  0x87   : > { %p1527_p13 = pnand %p1526_p12, %p1525_p0 }
  0x88   : > { %p1532_p2 = por %p1531_p6, %p1530_p9 }
  0x89   : > { %p1528_p5 = pneg %p1527_p13 }
  0x8a   : > { %p1534_p10 = por %p1533_p8, %p1532_p2 }
  0x8c   : > { %p1535_p3 = pnand %p1534_p10, %p1528_p5 }
  0x8e   : > { %1538 = shalt.err (!%p1535_p3)
}
  0x8f   : > { %s1539_s26 = scalar_lea.vmem %s2100_s11, 1024  ;;  %s1755_s10 = smov [#allocation8]  }
  0x90   : > { %p1540_p7 = scmp.ne.s32.totalorder %s2100_s11, %s1539_s26  ;;  %s1544_s23 = sshll.u32 %s1755_s10, 4  ;;  %s1545_s23 = int_to_ptr.vmem [resolvable:$false] %s1544_s23 }
  0x91   : > { %s1546_s0 = scalar_lea.vmem %s1545_s23, 2048  ;;  %p1547_p11 = scmp.lt.s32.totalorder %s2100_s11, %s1545_s23 }
  0x92   : > { %p1542_p0 = pnand %p1540_p7, %p1526_p12  ;;  %p1548_p9 = scmp.lt.s32.totalorder %s1546_s0, %s1539_s26 }
  0x94   : > { %p1543_p13 = pneg %p1542_p0  ;;  %p1549_p6 = por %p1548_p9, %p1547_p11 }
  0x96   : > { %p1550_p2 = pnand %p1549_p6, %p1543_p13 }
  0x98   : > { %1553 = shalt.err (!%p1550_p2)
}
  0x99   : > { %1275 = dma.hbm_to_vmem [thread:$0]  (!%p2096_p1), %s2092_s1, 1024, %s2100_s11, %s1965_s12, %s2366_s25, %s2366_s25, %s2365_s29  }
  0x9a   : > { %236 = sbr.rel (%p2000_p4) target bundleno = 758 (0x2f6), region = 32  ;;  %s238_s19 = sand.u32 (!%p2000_p4), 1, %s1716_s22  }
  0x9b   : > { %s1046_s18 = sshll.u32 (!%p2000_p4), %s238_s19, 6  ;;  %s239_s7 = scalar_lea.sflag (!%p2000_p4), [#allocation4], %s238_s19 }
  0x9c   : > { %s2134_s8 = scalar_lea.vmem (!%p2000_p4), [#allocation3], %s1046_s18  ;;  %p2373_p11 = scmp.ne.s32.totalorder (!%p2000_p4), %s2361_s14, 0 }
  0xa1   : > { %1659 = dma.done.wait (%p2373_p11), %s239_s7, 1024  }
  0xa2   : > { %1661 = vsyncadd (%p2373_p11), %s239_s7, 4294966272  ;;  %s2374_s15 = sld [smem:[#allocation16_spill]]  ;;  %s2375_s5 = sld [smem:[#allocation24_spill]] }
  0xa3   : > { %s247_s26 = sand.u32 1, %s1876_s4  }
  0xa4   : > { %s248_s9 = scalar_lea.sflag [#allocation7], %s247_s26 }
  0xa8   : > { %s249_s12 = sand.u32 1, %s2374_s15   ;;  %p2376_p4 = scmp.ne.s32.totalorder %s2375_s5, 0 }
  0xa9   : > { %s1047_s29 = sshll.u32 %s249_s12, 6 }
  0xaa   : > { %s2142_s25 = scalar_lea.vmem [#allocation6], %s1047_s29 }
  0xab   : > { %1663 = dma.done.wait (%p2376_p4), %s248_s9, 1024  }
  0xac   : > { %1665 = vsyncadd (%p2376_p4), %s248_s9, 4294966272  ;;  %s258_s1 = sand.u32 1, %s1692_s16   ;;  %p2377_p1 = scmp.ne.s32.totalorder %s2370_s24, 0 }
  0xad   : > { %s1048_s11 = sshll.u32 %s258_s1, 6 }
  0xae   : > { %s2149_s14 = scalar_lea.vmem [#allocation8], %s1048_s11 }
  0xaf   : > { %1667 = dma.done.wait (%p2377_p1), %s248_s9, 1024  }
  0xb0   : > { %1669 = vsyncadd (%p2377_p1), %s248_s9, 4294966272  ;;  %s2378_s4 = sld [smem:[#allocation19_spill]]  ;;  %s2379_s10 = sld [smem:[#allocation18_spill]] }
  0xb1   : > { %s290_s23 = sand.u32 1, %s1680_s13  }
  0xb2   : > { %s1049_s0 = sshll.u32 %s290_s23, 6 }
  0xb3   : > { %s2160_s19 = scalar_lea.vmem [#allocation9], %s1049_s0 }
  0xb6   : > { %p297_p12 = scmp.eq.s32.totalorder %s2378_s4, 0  ;;  %p298_p5 = scmp.eq.s32.totalorder %s2379_s10, 0 }
  0xb8   : > { %p299_p8 = pnand %p298_p5, %p297_p12 }
  0xb9   : > { %v1756_v0 = vmov (!%p299_p8), 0.0  }
  0xba   : > { %302 = sbr.rel (%p299_p8) target bundleno = 194 (0xc2), region = 48  ;;  %303 = vst [vmem:[#allocation2] sm:$0xff] (!%p299_p8), %v1756_v0  ;;  %304 = vst [vmem:[#allocation2 + $0x8] sm:$0xff] (!%p299_p8), %v1756_v0 }
  0xbb   : > { %305 = vst [vmem:[#allocation2 + $0x10] sm:$0xff] (!%p299_p8), %v1756_v0  ;;  %306 = vst [vmem:[#allocation2 + $0x18] sm:$0xff] (!%p299_p8), %v1756_v0 }
  0xbc   : > { %307 = vst [vmem:[#allocation2 + $0x20] sm:$0xff] (!%p299_p8), %v1756_v0  ;;  %308 = vst [vmem:[#allocation2 + $0x28] sm:$0xff] (!%p299_p8), %v1756_v0 }
  0xbd   : > { %309 = vst [vmem:[#allocation2 + $0x30] sm:$0xff] (!%p299_p8), %v1756_v0  ;;  %310 = vst [vmem:[#allocation2 + $0x38] sm:$0xff] (!%p299_p8), %v1756_v0 }
  0xbe   : > { %311 = vst [vmem:[#allocation2 + $0x40] sm:$0xff] (!%p299_p8), %v1756_v0  ;;  %312 = vst [vmem:[#allocation2 + $0x48] sm:$0xff] (!%p299_p8), %v1756_v0 }
  0xbf   : > { %313 = vst [vmem:[#allocation2 + $0x50] sm:$0xff] (!%p299_p8), %v1756_v0  ;;  %314 = vst [vmem:[#allocation2 + $0x58] sm:$0xff] (!%p299_p8), %v1756_v0 }
  0xc0   : > { %315 = vst [vmem:[#allocation2 + $0x60] sm:$0xff] (!%p299_p8), %v1756_v0  ;;  %316 = vst [vmem:[#allocation2 + $0x68] sm:$0xff] (!%p299_p8), %v1756_v0 }
  0xc1   : > { %317 = vst [vmem:[#allocation2 + $0x70] sm:$0xff] %v1756_v0  ;;  %318 = vst [vmem:[#allocation2 + $0x78] sm:$0xff] %v1756_v0 }
  0xc2 PF: > { %v1440_v1 = vld [vmem:[%s2149_s14] sm:$0xff]   ;;  %v1441_v2 = vld [vmem:[%s2149_s14 + $0x8] sm:$0xff]   ;;  %v1442_v3 = vld [vmem:[%s2149_s14 + $0x10] sm:$0xff]   ;;  %s2380_s24 = sld [smem:[#allocation19_spill]]  ;;  %s2381_s18 = sld [smem:[#allocation18_spill]] }
  0xc3   : > { %1194 = vmatprep.subr.bf16.mxu0 %v1440_v1  ;;  %v1443_v4 = vld [vmem:[%s2149_s14 + $0x18] sm:$0xff]   ;;  %v1448_v5 = vld [vmem:[%s2142_s25] sm:$0xff]   ;;  %v1445_v7 = vld [vmem:[%s2149_s14 + $0x28] sm:$0xff]  }
  0xc4   : > { %1195 = vmatpush3.bf16.msra.mxu0 %v1440_v1  ;;  %1210 = vmatprep.mubr.bf16.mxu0 %v1448_v5  ;;  %v1444_v6 = vld [vmem:[%s2149_s14 + $0x20] sm:$0xff]   ;;  %v1446_v8 = vld [vmem:[%s2149_s14 + $0x30] sm:$0xff]   ;;  %v1447_v9 = vld [vmem:[%s2149_s14 + $0x38] sm:$0xff]  }
  0xc5   : > { %1196 = vmatprep.subr.bf16.mxu0 %v1441_v2  ;;  %v1449_v10 = vld [vmem:[%s2142_s25 + $0x8] sm:$0xff]   ;;  %v1450_v11 = vld [vmem:[%s2142_s25 + $0x10] sm:$0xff]   ;;  %v1451_v12 = vld [vmem:[%s2142_s25 + $0x18] sm:$0xff]  }
  0xc6   : > { %v1452_v13 = vld [vmem:[%s2142_s25 + $0x20] sm:$0xff]   ;;  %v1453_v14 = vld [vmem:[%s2142_s25 + $0x28] sm:$0xff]   ;;  %v1454_v15 = vld [vmem:[%s2142_s25 + $0x30] sm:$0xff]  }
  0xc7   : > { %v1455_v16 = vld [vmem:[%s2142_s25 + $0x38] sm:$0xff]   ;;  %v1456_v17 = vld [vmem:[%s2134_s8] sm:$0xff]   ;;  %v1457_v42 = vld [vmem:[%s2134_s8 + $0x8] sm:$0xff]  }
  0xc8   : > { %1197 = vmatpush3.bf16.msra.mxu0 %v1441_v2  ;;  %1242 = vmatprep.mubr.bf16.mxu1 %v1456_v17  ;;  %v1458_v43 = vld [vmem:[%s2134_s8 + $0x10] sm:$0xff]   ;;  %v1459_v44 = vld [vmem:[%s2134_s8 + $0x18] sm:$0xff]   ;;  %v1460_v45 = vld [vmem:[%s2134_s8 + $0x20] sm:$0xff]   ;;  %p761_p10 = scmp.eq.s32.totalorder %s2380_s24, 2  ;;  %p762_p3 = scmp.eq.s32.totalorder %s2381_s18, 1 }
  0xc9   : > { %1198 = vmatprep.subr.bf16.mxu0 %v1442_v3  ;;  %v1461_v46 = vld [vmem:[%s2134_s8 + $0x28] sm:$0xff]   ;;  %v1462_v47 = vld [vmem:[%s2134_s8 + $0x30] sm:$0xff]   ;;  %v1463_v48 = vld [vmem:[%s2134_s8 + $0x38] sm:$0xff]  }
  0xca   : > { %p2188_p7 = pnand %p762_p3, %p761_p10  ;;  %v546_v49 = vld [vmem:[#allocation2 + $0x10] sm:$0xff]  ;;  %v544_v50 = vld [vmem:[#allocation2] sm:$0xff]  ;;  %v547_v52 = vld [vmem:[#allocation2 + $0x18] sm:$0xff] }
  0xcb   : > { %v545_v55 = vld [vmem:[#allocation2 + $0x8] sm:$0xff]  ;;  %v550_v61 = vld [vmem:[#allocation2 + $0x30] sm:$0xff]  ;;  %v548_v62 = vld [vmem:[#allocation2 + $0x20] sm:$0xff] }
  0xcc   : > { %1199 = vmatpush3.bf16.msra.mxu0 %v1442_v3  ;;  %v551_v0 = vld [vmem:[#allocation2 + $0x38] sm:$0xff]  ;;  %v549_v3 = vld [vmem:[#allocation2 + $0x28] sm:$0xff] }
  0xcd   : > { %1200 = vmatprep.subr.bf16.mxu0 %v1443_v4 }
  0xd0   : > { %1201 = vmatpush3.bf16.msra.mxu0 %v1443_v4 }
  0xd1   : > { %1202 = vmatprep.subr.bf16.mxu0 %v1444_v6 }
  0xd4   : > { %1203 = vmatpush3.bf16.msra.mxu0 %v1444_v6 }
  0xd5   : > { %1204 = vmatprep.subr.bf16.mxu0 %v1445_v7 }
  0xd8   : > { %1205 = vmatpush3.bf16.msra.mxu0 %v1445_v7 }
  0xd9   : > { %1206 = vmatprep.subr.bf16.mxu0 %v1446_v8 }
  0xdc   : > { %1207 = vmatpush3.bf16.msra.mxu0 %v1446_v8 }
  0xdd   : > { %1208 = vmatprep.subr.bf16.mxu0 %v1447_v9 }
  0xe0   : > { %1209 = vmatpush3.bf16.msra.mxu0 %v1447_v9  ;;  %v554_v9 = vld [vmem:[#allocation2 + $0x50] sm:$0xff] }
  0xe3   : > { %1211 = vmatmul.mubr.bf16.vlgmr.msra.gmra.mrb[0].mxu0 %v1449_v10  ;;  %v552_v10 = vld [vmem:[#allocation2 + $0x40] sm:$0xff] }
  0xe4   : > { %1214 = vmatprep.mubr.bf16.mxu0 %v1450_v11 }
  0xeb   : > { %1215 = vmatmul.mubr.bf16.gmra.mrb[4].mxu0 %v1451_v12  ;;  %v555_v12 = vld [vmem:[#allocation2 + $0x58] sm:$0xff] }
  0xec   : > { %1218 = vmatprep.mubr.bf16.mxu0 %v1452_v13 }
  0xf3   : > { %1219 = vmatmul.mubr.bf16.gmra.mrb[8].mxu0 %v1453_v14 }
  0xf4   : > { %1222 = vmatprep.mubr.bf16.mxu0 %v1454_v15  ;;  %v553_v15 = vld [vmem:[#allocation2 + $0x48] sm:$0xff] }
  0xfb   : > { %1223 = vmatmul.mubr.bf16.gmra.mrb[12].mxu0 %v1455_v16 }
 0x1b6   : > { %v1212_v18 = vpop.f32.mrb[0].mxu0 }
 0x1b7   : > { %v481_v19 = vpop.f32.mrb[1].mxu0 }
 0x1b8   : > { %v1213_v20 = vpop.f32.mrb[2].mxu0 }
 0x1b9   : > { %v577_v21 = vpack.c.bf16 %v1213_v20, %v1212_v18  ;;  %v484_v22 = vpop.f32.mrb[3].mxu0 }
 0x1ba   : > { %v576_v23 = vpack.c.bf16 %v484_v22, %v481_v19  ;;  %v556_v22 = vld [vmem:[#allocation2 + $0x60] sm:$0xff] }
 0x1bc   : > { %1226 = vmatprep.subr.bf16.mxu1 %v576_v23 }
 0x1bd   : > { %1227 = vmatpush3.bf16.msra.mxu1 %v576_v23 }
 0x1be   : > { %v1216_v24 = vpop.f32.mrb[4].mxu0  ;;  %1228 = vmatprep.subr.bf16.mxu1 %v577_v21 }
 0x1bf   : > { %v497_v25 = vpop.f32.mrb[5].mxu0 }
 0x1c0   : > { %v1217_v26 = vpop.f32.mrb[6].mxu0 }
 0x1c1   : > { %v579_v27 = vpack.c.bf16 %v1217_v26, %v1216_v24  ;;  %v500_v28 = vpop.f32.mrb[7].mxu0  ;;  %1229 = vmatpush3.bf16.msra.mxu1 %v577_v21  ;;  %v558_v21 = vld [vmem:[#allocation2 + $0x70] sm:$0xff]  ;;  %v559_v24 = vld [vmem:[#allocation2 + $0x78] sm:$0xff] }
 0x1c2   : > { %v578_v29 = vpack.c.bf16 %v500_v28, %v497_v25 }
 0x1c4   : > { %1230 = vmatprep.subr.bf16.mxu1 %v578_v29 }
 0x1c5   : > { %1231 = vmatpush3.bf16.msra.mxu1 %v578_v29 }
 0x1c6   : > { %v1220_v30 = vpop.f32.mrb[8].mxu0  ;;  %1232 = vmatprep.subr.bf16.mxu1 %v579_v27 }
 0x1c7   : > { %v513_v31 = vpop.f32.mrb[9].mxu0 }
 0x1c8   : > { %v1221_v32 = vpop.f32.mrb[10].mxu0 }
 0x1c9   : > { %v581_v33 = vpack.c.bf16 %v1221_v32, %v1220_v30  ;;  %v516_v34 = vpop.f32.mrb[11].mxu0  ;;  %1233 = vmatpush3.bf16.msra.mxu1 %v579_v27  ;;  %v557_v27 = vld [vmem:[#allocation2 + $0x68] sm:$0xff] }
 0x1ca   : > { %v580_v35 = vpack.c.bf16 %v516_v34, %v513_v31 }
 0x1cc   : > { %1234 = vmatprep.subr.bf16.mxu1 %v580_v35 }
 0x1cd   : > { %1235 = vmatpush3.bf16.msra.mxu1 %v580_v35 }
 0x1ce   : > { %v1224_v36 = vpop.f32.mrb[12].mxu0  ;;  %1236 = vmatprep.subr.bf16.mxu1 %v581_v33 }
 0x1cf   : > { %v529_v37 = vpop.f32.mrb[13].mxu0 }
 0x1d0   : > { %v1225_v38 = vpop.f32.mrb[14].mxu0 }
 0x1d1   : > { %v583_v39 = vpack.c.bf16 %v1225_v38, %v1224_v36  ;;  %v532_v40 = vpop.f32.mrb[15].mxu0  ;;  %1237 = vmatpush3.bf16.msra.mxu1 %v581_v33 }
 0x1d2   : > { %v582_v41 = vpack.c.bf16 %v532_v40, %v529_v37 }
 0x1d4   : > { %1238 = vmatprep.subr.bf16.mxu1 %v582_v41 }
 0x1d5   : > { %1239 = vmatpush3.bf16.msra.mxu1 %v582_v41 }
 0x1d6   : > { %1240 = vmatprep.subr.bf16.mxu1 %v583_v39 }
 0x1d9   : > { %1241 = vmatpush3.bf16.msra.mxu1 %v583_v39 }
 0x1dc   : > { %1243 = vmatmul.mubr.bf16.vlgmr.msra.gmra.mrb[0].mxu1 %v1457_v42 }
 0x1dd   : > { %1246 = vmatprep.mubr.bf16.mxu1 %v1458_v43 }
 0x1e4   : > { %1247 = vmatmul.mubr.bf16.gmra.mrb[4].mxu1 %v1459_v44 }
 0x1e5   : > { %1250 = vmatprep.mubr.bf16.mxu1 %v1460_v45 }
 0x1ec   : > { %1251 = vmatmul.mubr.bf16.gmra.mrb[8].mxu1 %v1461_v46 }
 0x1ed   : > { %1254 = vmatprep.mubr.bf16.mxu1 %v1462_v47 }
 0x1f4   : > { %1255 = vmatmul.mubr.bf16.gmra.mrb[12].mxu1 %v1463_v48 }
 0x2af   : > { %v1244_v51 = vpop.f32.mrb[0].mxu1 }
 0x2b0   : > { %v731_v53 = vadd.f32 %v1244_v51, %v546_v49  ;;  %v666_v54 = vpop.f32.mrb[1].mxu1 }
 0x2b1   : > { %v729_v56 = vadd.f32 %v666_v54, %v544_v50  ;;  %v1245_v57 = vpop.f32.mrb[2].mxu1 }
 0x2b2   : > { %747 = vst [vmem:[#allocation2 + $0x10] sm:$0xff] %v731_v53  ;;  %v732_v58 = vadd.f32 %v1245_v57, %v547_v52  ;;  %v669_v59 = vpop.f32.mrb[3].mxu1 }
 0x2b3   : > { %745 = vst [vmem:[#allocation2] sm:$0xff] %v729_v56  ;;  %v730_v60 = vadd.f32 %v669_v59, %v545_v55 }
 0x2b4   : > { %748 = vst [vmem:[#allocation2 + $0x18] sm:$0xff] %v732_v58 }
 0x2b5   : > { %746 = vst [vmem:[#allocation2 + $0x8] sm:$0xff] %v730_v60 }
 0x2b7   : > { %v1248_v63 = vpop.f32.mrb[4].mxu1 }
 0x2b8   : > { %v735_v1 = vadd.f32 %v1248_v63, %v550_v61  ;;  %v682_v2 = vpop.f32.mrb[5].mxu1 }
 0x2b9   : > { %v733_v4 = vadd.f32 %v682_v2, %v548_v62  ;;  %v1249_v5 = vpop.f32.mrb[6].mxu1  ;;  %v769_v35 = vld [vmem:[#allocation2 + $0x10] sm:$0xff] (!%p2188_p7) }
 0x2ba   : > { %751 = vst [vmem:[#allocation2 + $0x30] sm:$0xff] %v735_v1  ;;  %v736_v6 = vadd.f32 %v1249_v5, %v551_v0  ;;  %v685_v7 = vpop.f32.mrb[7].mxu1  ;;  %v767_v33 = vld [vmem:[#allocation2] sm:$0xff] (!%p2188_p7)  ;;  %v785_v39 = vmax.f32 (!%p2188_p7), %v769_v35, 0.0 }
 0x2bb   : > { %749 = vst [vmem:[#allocation2 + $0x20] sm:$0xff] %v733_v4  ;;  %v734_v8 = vadd.f32 %v685_v7, %v549_v3  ;;  %v783_v36 = vmax.f32 (!%p2188_p7), %v767_v33, 0.0  ;;  %v770_v38 = vld [vmem:[#allocation2 + $0x18] sm:$0xff] (!%p2188_p7) }
 0x2bc   : > { %752 = vst [vmem:[#allocation2 + $0x38] sm:$0xff] %v736_v6  ;;  %v768_v34 = vld [vmem:[#allocation2 + $0x8] sm:$0xff] (!%p2188_p7)  ;;  %v786_v42 = vmax.f32 (!%p2188_p7), %v770_v38, 0.0 }
 0x2bd   : > { %750 = vst [vmem:[#allocation2 + $0x28] sm:$0xff] %v734_v8  ;;  %v784_v37 = vmax.f32 (!%p2188_p7), %v768_v34, 0.0 }
 0x2be   : > { %v1123_v55 = vpack.c.bf16 (!%p2188_p7), %v786_v42, %v785_v39 }
 0x2bf   : > { %v1252_v11 = vpop.f32.mrb[8].mxu1  ;;  %v1118_v48 = vpack.c.bf16 (!%p2188_p7), %v784_v37, %v783_v36 }
 0x2c0   : > { %v739_v13 = vadd.f32 %v1252_v11, %v554_v9  ;;  %v698_v14 = vpop.f32.mrb[9].mxu1  ;;  %1155 = vst [vmem:[%s2160_s19 + $0x8] sm:$0xff] (!%p2188_p7), %v1123_v55  }
 0x2c1   : > { %v737_v16 = vadd.f32 %v698_v14, %v552_v10  ;;  %v1253_v17 = vpop.f32.mrb[10].mxu1  ;;  %v773_v45 = vld [vmem:[#allocation2 + $0x30] sm:$0xff] (!%p2188_p7)  ;;  %1119 = vst [vmem:[%s2160_s19] sm:$0xff] (!%p2188_p7), %v1118_v48  }
 0x2c2   : > { %755 = vst [vmem:[#allocation2 + $0x50] sm:$0xff] %v739_v13  ;;  %v740_v18 = vadd.f32 %v1253_v17, %v555_v12  ;;  %v701_v19 = vpop.f32.mrb[11].mxu1  ;;  %v771_v40 = vld [vmem:[#allocation2 + $0x20] sm:$0xff] (!%p2188_p7)  ;;  %v789_v49 = vmax.f32 (!%p2188_p7), %v773_v45, 0.0 }
 0x2c3   : > { %753 = vst [vmem:[#allocation2 + $0x40] sm:$0xff] %v737_v16  ;;  %v738_v20 = vadd.f32 %v701_v19, %v553_v15  ;;  %v787_v43 = vmax.f32 (!%p2188_p7), %v771_v40, 0.0  ;;  %v774_v46 = vld [vmem:[#allocation2 + $0x38] sm:$0xff] (!%p2188_p7) }
 0x2c4   : > { %756 = vst [vmem:[#allocation2 + $0x58] sm:$0xff] %v740_v18  ;;  %v772_v41 = vld [vmem:[#allocation2 + $0x28] sm:$0xff] (!%p2188_p7)  ;;  %v790_v50 = vmax.f32 (!%p2188_p7), %v774_v46, 0.0 }
 0x2c5   : > { %754 = vst [vmem:[#allocation2 + $0x48] sm:$0xff] %v738_v20  ;;  %v788_v44 = vmax.f32 (!%p2188_p7), %v772_v41, 0.0 }
 0x2c6   : > { %v1133_v62 = vpack.c.bf16 (!%p2188_p7), %v790_v50, %v789_v49 }
 0x2c7   : > { %v1256_v23 = vpop.f32.mrb[12].mxu1  ;;  %766 = sbr.rel (%p2188_p7) target bundleno = 730 (0x2da), region = 52  ;;  %v1128_v56 = vpack.c.bf16 (!%p2188_p7), %v788_v44, %v787_v43 }
 0x2c8   : > { %v743_v25 = vadd.f32 %v1256_v23, %v558_v21  ;;  %v714_v26 = vpop.f32.mrb[13].mxu1  ;;  %1157 = vst [vmem:[%s2160_s19 + $0x18] sm:$0xff] (!%p2188_p7), %v1133_v62  }
 0x2c9   : > { %v741_v28 = vadd.f32 %v714_v26, %v556_v22  ;;  %v1257_v29 = vpop.f32.mrb[14].mxu1  ;;  %v777_v53 = vld [vmem:[#allocation2 + $0x50] sm:$0xff] (!%p2188_p7)  ;;  %1156 = vst [vmem:[%s2160_s19 + $0x10] sm:$0xff] (!%p2188_p7), %v1128_v56  }
 0x2ca   : > { %759 = vst [vmem:[#allocation2 + $0x70] sm:$0xff] %v743_v25  ;;  %v744_v30 = vadd.f32 %v1257_v29, %v559_v24  ;;  %v717_v31 = vpop.f32.mrb[15].mxu1  ;;  %v775_v47 = vld [vmem:[#allocation2 + $0x40] sm:$0xff] (!%p2188_p7)  ;;  %v793_v58 = vmax.f32 (!%p2188_p7), %v777_v53, 0.0 }
 0x2cb   : > { %757 = vst [vmem:[#allocation2 + $0x60] sm:$0xff] %v741_v28  ;;  %v742_v32 = vadd.f32 %v717_v31, %v557_v27  ;;  %v791_v52 = vmax.f32 (!%p2188_p7), %v775_v47, 0.0  ;;  %v778_v54 = vld [vmem:[#allocation2 + $0x58] sm:$0xff] (!%p2188_p7) }
 0x2cc   : > { %760 = vst [vmem:[#allocation2 + $0x78] sm:$0xff] %v744_v30  ;;  %v776_v51 = vld [vmem:[#allocation2 + $0x48] sm:$0xff] (!%p2188_p7)  ;;  %v794_v63 = vmax.f32 (!%p2188_p7), %v778_v54, 0.0 }
 0x2cd   : > { %758 = vst [vmem:[#allocation2 + $0x68] sm:$0xff] %v742_v32  ;;  %v792_v57 = vmax.f32 (!%p2188_p7), %v776_v51, 0.0 }
 0x2ce   : > { %v1143_v6 = vpack.c.bf16 %v794_v63, %v793_v58 }
 0x2cf   : > { %v1138_v3 = vpack.c.bf16 %v792_v57, %v791_v52 }
 0x2d0   : > { %1159 = vst [vmem:[%s2160_s19 + $0x28] sm:$0xff] %v1143_v6  }
 0x2d1   : > { %v781_v61 = vld [vmem:[#allocation2 + $0x70] sm:$0xff]  ;;  %1158 = vst [vmem:[%s2160_s19 + $0x20] sm:$0xff] %v1138_v3  }
 0x2d2   : > { %v779_v59 = vld [vmem:[#allocation2 + $0x60] sm:$0xff]  ;;  %v797_v4 = vmax.f32 %v781_v61, 0.0 }
 0x2d3   : > { %v795_v0 = vmax.f32 %v779_v59, 0.0  ;;  %v782_v2 = vld [vmem:[#allocation2 + $0x78] sm:$0xff] }
 0x2d4   : > { %v780_v60 = vld [vmem:[#allocation2 + $0x68] sm:$0xff]  ;;  %v798_v5 = vmax.f32 %v782_v2, 0.0 }
 0x2d5   : > { %v796_v1 = vmax.f32 %v780_v60, 0.0 }
 0x2d6   : > { %v1153_v8 = vpack.c.bf16 %v798_v5, %v797_v4 }
 0x2d7   : > { %v1148_v7 = vpack.c.bf16 %v796_v1, %v795_v0 }
 0x2d8   : > { %1161 = vst [vmem:[%s2160_s19 + $0x38] sm:$0xff] %v1153_v8  }
 0x2d9   : > { %1160 = vst [vmem:[%s2160_s19 + $0x30] sm:$0xff] %v1148_v7  }
 0x2da PF: > { %s2383_s8 = sld [smem:[#allocation20_spill]]  ;;  %s2384_s12 = sld [smem:[#allocation31_spill]] }
 0x2db   : > { %s893_s25 = sshll.u32 %s2160_s19, 4  ;;  %s2213_s1 = scalar_lea.sflag [#allocation5], %s290_s23  ;;  %s2209_s25 = int_to_ptr.vmem [resolvable:$true] %s893_s25 }
 0x2dc   : > { %s1554_s11 = scalar_lea.vmem %s2209_s25, 1024  ;;  %p2386_p13 = scmp.ne.s32.totalorder %s2349_s6, 0 }
 0x2dd   : > { %p1555_p0 = scmp.ne.s32.totalorder %s2209_s25, %s1554_s11  ;;  %s1757_s14 = smov [#allocation9]  }
 0x2de   : > { %s1558_s4 = sshll.u32 %s1757_s14, 4  ;;  %s1559_s4 = int_to_ptr.vmem [resolvable:$false] %s1558_s4 }
 0x2df   : > { %p1556_p9 = pnand %p1555_p0, %p2386_p13  ;;  %s1560_s10 = scalar_lea.vmem %s1559_s4, 2048 }
 0x2e0   : > { %s1114_s15 = sshll.u32 %s2383_s8, 10  ;;  %s2385_s9 = smov %s2384_s12 }
 0x2e1   : > { %s2206_s29 = scalar_lea.hbm %s2384_s12, %s1114_s15  ;;  %p1557_p6 = pneg %p1556_p9 }
 0x2e2   : > { %p1561_p2 = scmp.lt.s32.totalorder %s2209_s25, %s1559_s4  ;;  %p1562_p11 = scmp.lt.s32.totalorder %s1560_s10, %s1554_s11 }
 0x2e4   : > { %p1563_p4 = por %p1562_p11, %p1561_p2 }
 0x2e6   : > { %p1564_p1 = pnand %p1563_p4, %p1557_p6 }
 0x2e8   : > { %1567 = shalt.err (!%p1564_p1)
}
 0x2e9   : > { %s1568_s23 = scalar_lea.hbm %s2206_s29, 1024  ;;  %s1572_s24 = scalar_lea.hbm %s2385_s9, 2048 }
 0x2ea   : > { %p1569_p12 = scmp.ne.s32.totalorder %s2206_s29, %s1568_s23  ;;  %p1573_p10 = scmp.lt.u32.totalorder %s2206_s29, %s2385_s9 }
 0x2eb   : > { %p1574_p3 = scmp.lt.u32.totalorder %s1572_s24, %s1568_s23  ;;  %p1576_p0 = scmp.lt.u32.totalorder %s1568_s23, %s2206_s29 }
 0x2ec   : > { %p1570_p5 = pnand %p1569_p12, %p2386_p13 }
 0x2ed   : > { %p1575_p7 = por %p1574_p3, %p1573_p10 }
 0x2ee   : > { %p1571_p8 = pneg %p1570_p5 }
 0x2ef   : > { %p1577_p9 = por %p1576_p0, %p1575_p7 }
 0x2f1   : > { %p1578_p6 = pnand %p1577_p9, %p1571_p8 }
 0x2f3   : > { %1581 = shalt.err (!%p1578_p6)
}
 0x2f4   : > { %s1758_s8 = smov 64   ;;  %s1759_s15 = smov 4  }
 0x2f5   : > { %1264 = dma.vmem_to_hbm [thread:$0]  (%p2386_p13), %s2209_s25, 1024, %s2206_s29, %s2213_s1, %s1758_s8, %s1758_s8, %s1759_s15  }
 0x2f6 PF: > { %s2387_s5 = sld [smem:[#allocation14_spill]]  ;;  %p1281_p2 = scmp.ge.s32.totalorder %s1748_s30, 2 }
 0x2f7   : > { %p2388_p11 = scmp.ne.s32.totalorder %s2351_s3, 0 }
 0x2f9   : > { %p1277_p4 = pnand %p1281_p2, %p2388_p11 }
 0x2fc   : > { %s908_s26 = sand.u32 1, %s2387_s5  }
 0x2fd   : > { %s909_s12 = scalar_lea.sflag [#allocation5], %s908_s26 }
 0x2fe   : > { %1671 = dma.done.wait (!%p1277_p4), %s909_s12, 1024  }
 0x2ff   : > { %1673 = vsyncadd (!%p1277_p4), %s909_s12, 4294966272  ;;  %s22_s30 = sadd.s32 1, %s1748_s30   ;;  %s2390_s6 = sld [smem:[#allocation15_spill]] }
 0x300   : > { %p2242_p1 = scmp.ge.s32.totalorder %s22_s30, 14   ;;  %s2391_s14 = sld [smem:[#allocation27_spill]] }
 0x301   : > { %s2392_s18 = sld [smem:[#allocation16_spill]]  ;;  %s2393_s29 = sld [smem:[#allocation25_spill]] }
 0x302   : > { %s2394_s3 = sld [smem:[#allocation17_spill]]  ;;  %s2395_s23 = sld [smem:[#allocation28_spill]] }
 0x303   : > { %s2396_s26 = sld [smem:[#allocation21_spill]]  ;;  %s2397_s1 = sld [smem:[#allocation22_spill]] }
 0x304   : > { %s2398_s12 = smov %s1680_s13  ;;  %s2399_s4 = sld [smem:[#allocation23_spill]] }
 0x305   : > { %s2400_s13 = smov %s2390_s6  ;;  %s2401_s10 = sld [smem:[#allocation26_spill]] }
 0x306   : > { %s2402_s15 = smov %s1692_s16  ;;  %s2403_s16 = smov %s1696_s17 }
 0x307   : > { %s2404_s17 = smov %s2073_s21  ;;  %s2405_s19 = smov %s1708_s20 }
 0x308   : > { %s2406_s20 = smov %s2393_s29  ;;  %s2407_s21 = smov %s1716_s22 }
 0x309   : > { %s2408_s22 = smov %s2394_s3  ;;  %s2409_s24 = smov %s1736_s27 }
 0x30a   : > { %s2410_s25 = smov %s1740_s28  ;;  %s2411_s27 = smov %s2397_s1 }
 0x30b   : > { %s2412_s28 = smov %s2399_s4  ;;  %s2413_s29 = smov %s2401_s10 }
 0x30c   :  { %21 = sbr.rel (!%p2242_p1) target bundleno = 19 (0x13), region = 109 }
 0x313   :  { %914 = vsyncpa [#allocation4], 1 }
 0x314   :  { %916 = vsyncpa [#allocation4 + $0x1], 1 }
 0x315   :  { %917 = vsyncpa [#allocation7], 1 }
 0x316   :  { %919 = vsyncpa [#allocation7 + $0x1], 1 }
 0x317   :  { %920 = vsyncpa [#allocation5], 1 }
 0x318   :  { %922 = vsyncpa [#allocation5 + $0x1], 1 }

</bundles_post_ra>
